<compile_context>
chip_gen: v6e
topology: v6e:2x2x1
jax: 0.10.0
libtpu: 0.0.40
codegen_flags: <defaults>
</compile_context>

<pallas_src>
import functools
import math

import jax
import jax.numpy as jnp
from jax.experimental import pallas as pl
from jax.experimental.pallas import tpu as pltpu


def _round_up(n, m):
    return ((n + m - 1) // m) * m


def _proposal_uniform_discrete_kernel(x_ref, w1_ref, b1_ref, w2_ref, b2_ref,
                                      o_ref, *, softmax_boost):
    # lin1 + ReLU  (bf16 operands on the MXU, f32 accumulate)
    h = jnp.dot(x_ref[...], w1_ref[...], preferred_element_type=jnp.float32)
    h = jnp.maximum(h + b1_ref[...], 0.0)                        # (tb, D) f32

    # lin2, then scale by softmax_boost (matches lin2(x).mul_(boost))
    y = jnp.dot(h.astype(jnp.bfloat16), w2_ref[...],
                preferred_element_type=jnp.float32)
    y = (y + b2_ref[...]) * softmax_boost                        # (tb, O) f32

    # Numerically-stable softmax over the last dim, whole-tile math.
    # Exact divide so each row sums to 1 at f32 precision (approx reciprocal
    # was only ~1e-3 accurate and broke downstream normalization assumptions).
    y_max = jnp.max(y, axis=-1, keepdims=True)
    e = jnp.exp(y - y_max)
    denom = jnp.sum(e, axis=-1, keepdims=True)
    o_ref[...] = (e / denom).astype(o_ref.dtype)


def proposal_uniform_discrete_forward(x, w1_t, b1, w2_t, b2,
                                      softmax_boost=1.0, tile_b=512):
    """x: (B, D) f32; w1_t: (D, D); b1: (D,); w2_t: (D, O); b2: (O,)."""
    B, D = x.shape
    O = w2_t.shape[1]

    # --- batch tiling: one tile for small B, near-even split for large B ----
    B8 = _round_up(max(B, 1), 8)                 # sublane multiple only
    if B8 <= tile_b:
        tb, steps = B8, 1                        # grid=(1,), no per-step overhead
    else:
        steps = -(-B8 // tile_b)                 # ceil
        tb = _round_up(-(-B8 // steps), 8)       # near-even tiles, tiny pad waste
    B_pad = tb * steps
    if B_pad != B:
        x = jnp.pad(x, ((0, B_pad - B), (0, 0)))

    # bf16 streamed input + resident weights: halves HBM->VMEM DMA bytes and
    # hits the native single-pass MXU path; biases stay f32 for the epilogue.
    x_bf = x.astype(jnp.bfloat16)
    w1_bf = w1_t.astype(jnp.bfloat16)
    w2_bf = w2_t.astype(jnp.bfloat16)
    b1_2d = b1.reshape(1, D).astype(jnp.float32)
    b2_2d = b2.reshape(1, O).astype(jnp.float32)

    kernel = functools.partial(_proposal_uniform_discrete_kernel,
                               softmax_boost=float(softmax_boost))

    out = pl.pallas_call(
        kernel,
        out_shape=jax.ShapeDtypeStruct((B_pad, O), jnp.float32),
        grid=(steps,),
        in_specs=[
            pl.BlockSpec((tb, D), lambda i: (i, 0)),    # x     (tiled on batch)
            pl.BlockSpec((D, D), lambda i: (0, 0)),     # w1_t  (resident)
            pl.BlockSpec((1, D), lambda i: (0, 0)),     # b1    (resident)
            pl.BlockSpec((D, O), lambda i: (0, 0)),     # w2_t  (resident)
            pl.BlockSpec((1, O), lambda i: (0, 0)),     # b2    (resident)
        ],
        out_specs=pl.BlockSpec((tb, O), lambda i: (i, 0)),
        compiler_params=pltpu.CompilerParams(
            dimension_semantics=("parallel",)),         # shards across TCs on v7x
    )(x_bf, w1_bf, b1_2d, w2_bf, b2_2d)

    # forward() returns (True, tensor) in the PyTorch module
    return True, out[:B]


def _xavier_uniform(key, shape, gain=1.0):
    # shape is (fan_out, fan_in) as in torch.nn.Linear.weight
    fan_out, fan_in = shape
    bound = gain * math.sqrt(6.0 / (fan_in + fan_out))
    return jax.random.uniform(key, shape, jnp.float32, -bound, bound)


def _linear_bias(key, fan_in, out_dim):
    # torch default Linear bias init: U(-1/sqrt(fan_in), 1/sqrt(fan_in))
    bound = 1.0 / math.sqrt(fan_in)
    return jax.random.uniform(key, (out_dim,), jnp.float32, -bound, bound)


if __name__ == "__main__":
    B, D, O = 16, 32, 16          # batch=16, input_dim=32, output_dim=16
    softmax_boost = 1.0

    key = jax.random.PRNGKey(0)
    kx, kw1, kb1, kw2, kb2 = jax.random.split(key, 5)

    x = jax.random.normal(kx, (B, D), jnp.float32)

    # PyTorch-shaped weights (out, in), xavier_uniform init
    relu_gain = math.sqrt(2.0)                      # init.calculate_gain('relu')
    w1 = _xavier_uniform(kw1, (D, D), gain=relu_gain)
    w2 = _xavier_uniform(kw2, (O, D), gain=1.0)
    b1 = _linear_bias(kb1, D, D)
    b2 = _linear_bias(kb2, D, O)

    # pre-transpose for y = x @ W.T + b
    w1_t = w1.T                                     # (D, D)
    w2_t = w2.T                                     # (D, O)

    ok_flag, out = proposal_uniform_discrete_forward(
        x, w1_t, b1, w2_t, b2, softmax_boost)       # default tile_b -> grid=(1,)
    out = jax.block_until_ready(out)

    # reference in plain JAX, using the same bf16 matmul path as the kernel
    h_ref = jnp.maximum(
        jnp.dot(x.astype(jnp.bfloat16), w1_t.astype(jnp.bfloat16),
                preferred_element_type=jnp.float32) + b1, 0.0)
    y_ref = (jnp.dot(h_ref.astype(jnp.bfloat16), w2_t.astype(jnp.bfloat16),
                     preferred_element_type=jnp.float32) + b2) * softmax_boost
    ref = jax.nn.softmax(y_ref, axis=-1)

    assert ok_flag is True
    assert out.shape == (B, O)
    assert bool(jnp.all(jnp.isfinite(out)))
    assert bool(jnp.allclose(out.sum(axis=-1), 1.0, atol=1e-3))
    assert bool(jnp.allclose(out, ref, atol=2e-3, rtol=2e-3))

    print("KERNEL_OK")
</pallas_src>

<mosaic_0001>
module attributes {stable_mosaic.version = 11 : i64} {
  func.func @_proposal_uniform_discrete_kernel(%arg0: i32, %arg1: memref<16x32xbf16, #tpu.memory_space<vmem>>, %arg2: memref<32x32xbf16, #tpu.memory_space<vmem>>, %arg3: memref<1x32xf32, #tpu.memory_space<vmem>>, %arg4: memref<32x16xbf16, #tpu.memory_space<vmem>>, %arg5: memref<1x16xf32, #tpu.memory_space<vmem>>, %arg6: memref<16x16xf32, #tpu.memory_space<vmem>>) attributes {dimension_semantics = [#tpu.dimension_semantics<parallel>], iteration_bounds = array<i64: 1>, scalar_prefetch = 0 : i64, scratch_operands = 0 : i64, tpu.core_type = #tpu.core_type<tc>, window_params = [{transform_indices = @transform_0, window_bounds = array<i64: 16, 32>}, {pipeline_mode = #tpu.pipeline_mode<synchronous>, transform_indices = @transform_1, window_bounds = array<i64: 32, 32>}, {pipeline_mode = #tpu.pipeline_mode<synchronous>, transform_indices = @transform_2, window_bounds = array<i64: 1, 32>}, {pipeline_mode = #tpu.pipeline_mode<synchronous>, transform_indices = @transform_3, window_bounds = array<i64: 32, 16>}, {pipeline_mode = #tpu.pipeline_mode<synchronous>, transform_indices = @transform_4, window_bounds = array<i64: 1, 16>}, {transform_indices = @transform_5, window_bounds = array<i64: 16, 16>}]} {
    %c0 = arith.constant 0 : index
    %c0_0 = arith.constant 0 : index
    %0 = vector.load %arg1[%c0, %c0_0] : memref<16x32xbf16, #tpu.memory_space<vmem>>, vector<16x32xbf16>
    %c0_1 = arith.constant 0 : index
    %c0_2 = arith.constant 0 : index
    %1 = vector.load %arg2[%c0_1, %c0_2] : memref<32x32xbf16, #tpu.memory_space<vmem>>, vector<32x32xbf16>
    %cst = arith.constant dense<0.000000e+00> : vector<16x32xf32>
    %2 = tpu.matmul %0, %1, %cst {dimension_numbers = #tpu.dot_dimension_numbers<[1], [0], [0], [1], [0, 0, 1, 1], [], []>} : vector<16x32xbf16>, vector<32x32xbf16>, vector<16x32xf32> -> vector<16x32xf32>
    %c0_3 = arith.constant 0 : index
    %c0_4 = arith.constant 0 : index
    %3 = vector.load %arg3[%c0_3, %c0_4] : memref<1x32xf32, #tpu.memory_space<vmem>>, vector<1x32xf32>
    %4 = vector.broadcast %3 : vector<1x32xf32> to vector<16x32xf32>
    %5 = arith.addf %2, %4 : vector<16x32xf32>
    %cst_5 = arith.constant 0.000000e+00 : f32
    %6 = vector.broadcast %cst_5 : f32 to vector<16x32xf32>
    %7 = arith.maximumf %5, %6 : vector<16x32xf32>
    %8 = arith.truncf %7 : vector<16x32xf32> to vector<16x32xbf16>
    %c0_6 = arith.constant 0 : index
    %c0_7 = arith.constant 0 : index
    %9 = vector.load %arg4[%c0_6, %c0_7] : memref<32x16xbf16, #tpu.memory_space<vmem>>, vector<32x16xbf16>
    %cst_8 = arith.constant dense<0.000000e+00> : vector<16x16xf32>
    %10 = tpu.matmul %8, %9, %cst_8 {dimension_numbers = #tpu.dot_dimension_numbers<[1], [0], [0], [1], [0, 0, 1, 1], [], []>} : vector<16x32xbf16>, vector<32x16xbf16>, vector<16x16xf32> -> vector<16x16xf32>
    %c0_9 = arith.constant 0 : index
    %c0_10 = arith.constant 0 : index
    %11 = vector.load %arg5[%c0_9, %c0_10] : memref<1x16xf32, #tpu.memory_space<vmem>>, vector<1x16xf32>
    %12 = vector.broadcast %11 : vector<1x16xf32> to vector<16x16xf32>
    %13 = arith.addf %10, %12 : vector<16x16xf32>
    %cst_11 = arith.constant 1.000000e+00 : f32
    %14 = vector.broadcast %cst_11 : f32 to vector<16x16xf32>
    %15 = arith.mulf %13, %14 : vector<16x16xf32>
    %cst_12 = arith.constant dense<0xFF800000> : vector<16xf32>
    %16 = vector.multi_reduction <maximumf>, %15, %cst_12 [1] : vector<16x16xf32> to vector<16xf32>
    %17 = vector.shape_cast %16 : vector<16xf32> to vector<16x1xf32>
    %18 = vector.broadcast %17 : vector<16x1xf32> to vector<16x16xf32>
    %19 = arith.subf %15, %18 : vector<16x16xf32>
    %20 = math.exp %19 : vector<16x16xf32>
    %cst_13 = arith.constant dense<0.000000e+00> : vector<16xf32>
    %21 = vector.multi_reduction <add>, %20, %cst_13 [1] : vector<16x16xf32> to vector<16xf32>
    %22 = vector.shape_cast %21 : vector<16xf32> to vector<16x1xf32>
    %23 = vector.broadcast %22 : vector<16x1xf32> to vector<16x16xf32>
    %24 = arith.divf %20, %23 : vector<16x16xf32>
    %c0_14 = arith.constant 0 : index
    %c0_15 = arith.constant 0 : index
    %25 = vector.load %arg6[%c0_14, %c0_15] : memref<16x16xf32, #tpu.memory_space<vmem>>, vector<16x16xf32>
    tpu.vector_store %arg6[%c0_14, %c0_15], %24 {strides = array<i32>} : memref<16x16xf32, #tpu.memory_space<vmem>>, vector<16x16xf32>,
    return
  }
  func.func @transform_0(%arg0: i32) -> (i32, i32) {
    %c0_i32 = arith.constant 0 : i32
    %c0_i32_0 = arith.constant 0 : i32
    return %arg0, %c0_i32 : i32, i32
  }
  func.func @transform_1(%arg0: i32) -> (i32, i32) {
    %c0_i32 = arith.constant 0 : i32
    %c0_i32_0 = arith.constant 0 : i32
    %c0_i32_1 = arith.constant 0 : i32
    return %c0_i32, %c0_i32_0 : i32, i32
  }
  func.func @transform_2(%arg0: i32) -> (i32, i32) {
    %c0_i32 = arith.constant 0 : i32
    %c0_i32_0 = arith.constant 0 : i32
    %c0_i32_1 = arith.constant 0 : i32
    return %c0_i32, %c0_i32_0 : i32, i32
  }
  func.func @transform_3(%arg0: i32) -> (i32, i32) {
    %c0_i32 = arith.constant 0 : i32
    %c0_i32_0 = arith.constant 0 : i32
    %c0_i32_1 = arith.constant 0 : i32
    return %c0_i32, %c0_i32_0 : i32, i32
  }
  func.func @transform_4(%arg0: i32) -> (i32, i32) {
    %c0_i32 = arith.constant 0 : i32
    %c0_i32_0 = arith.constant 0 : i32
    %c0_i32_1 = arith.constant 0 : i32
    return %c0_i32, %c0_i32_0 : i32, i32
  }
  func.func @transform_5(%arg0: i32) -> (i32, i32) {
    %c0_i32 = arith.constant 0 : i32
    %c0_i32_0 = arith.constant 0 : i32
    return %arg0, %c0_i32 : i32, i32
  }
}

</mosaic_0001>

<bundles_post_ra>
// kernel: tpu_custom_call.1
= control target key start
LH: loop header
LB: loop body
LE: loop exit
PB: predicated region body
PF: predicated region fallthrough
CT: control target
= control target key end

     0   :  { %v279_v1 = vmov 0.0   ;;  %vm280_vm0 = vmmov 0   ;;  %s346_s0 = inlined_call_operand.vmem [shape: bf16[16,32], index: 0, kind: input, shape index: {}]   ;;  %s347_s1 = inlined_call_operand.vmem [shape: bf16[32,32], index: 1, kind: input, shape index: {}]   ;;  %s348_s2 = inlined_call_operand.vmem [shape: f32[1,32], index: 2, kind: input, shape index: {}]   ;;  %s349_s3 = inlined_call_operand.vmem [shape: bf16[32,16], index: 3, kind: input, shape index: {}]   ;;  %s350_s4 = inlined_call_operand.vmem [shape: f32[1,16], index: 4, kind: input, shape index: {}]   ;;  %s351_s5 = inlined_call_operand.hbm [shape: f32[16,16], index: 5, kind: output, shape index: {}]  }
   0x1   :  { %v244_v0 = vld [vmem:[%s347_s1 + $0x8] sm:$0xff]   ;;  %223 = vmatprep.subr.bf16.mxu0 %v279_v1  ;;  %231 = vmatprep.subr.bf16.mxu1 %v279_v1  ;;  %v245_v2 = vld [vmem:[%s347_s1] sm:$0xff]  }
   0x2   :  { %224 = vmatpush3.bf16.msra.mxu0 %v244_v0  ;;  %227 = vmatprep.mubr.msk.bf16.mxu0 %vm280_vm0, %v279_v1 }
   0x3   :  { %225 = vmatprep.subr.bf16.mxu0 %v279_v1  ;;  %235 = vmatprep.mubr.msk.bf16.mxu1 %vm280_vm0, %v279_v1 }
   0x4   :  { %10 = vsyncpa [#allocation3], 0  ;;  %v246_v3 = vld [vmem:[%s346_s0] sm:$0xff]   ;;  %vm52_vm1 = vcmask 261120   ;;  %v247_v4 = vld [vmem:[%s349_s3 + $0x8] sm:$0xff]   ;;  %vm167_vm2 = vcmask 130048  }
   0x5   :  { %232 = vmatpush3.bf16.msra.mxu1 %v247_v4  ;;  %v248_v5 = vld [vmem:[%s349_s3] sm:$0xff]  }
   0x6   :  { %226 = vmatpush3.bf16.msra.mxu0 %v245_v2  ;;  %233 = vmatprep.subr.bf16.mxu1 %v279_v1  ;;  %v208_v6 = vld [vmem:[%s348_s2] ss:$0 sm:$0xff]  ;;  %s281_s2 = smov [#allocation2]  }
   0x7   :  { %v213_v16 = vld [vmem:[%s350_s4] ss:$0 sm:$0xff]  ;;  %s197_s3 = sshll.u32 %s281_s2, 4  ;;  %s198_s3 = int_to_ptr.vmem [resolvable:$true] %s197_s3 }
   0x8   :  { %s257_s4 = scalar_lea.vmem %s198_s3, 256  ;;  %p262_p1 = scmp.lt.s32.totalorder %s198_s3, %s198_s3 }
   0x9   :  { %228 = vmatmul.mubr.msk.bf16.vlgmr.msra.gmra.mxu0 %vm52_vm1, %v246_v3  ;;  %234 = vmatpush3.bf16.msra.mxu1 %v248_v5  ;;  %p258_p0 = scmp.ne.s32.totalorder %s198_s3, %s257_s4  ;;  %p263_p2 = scmp.lt.s32.totalorder %s257_s4, %s257_s4 }
   0xb   :  { %p264_p3 = por %p263_p2, %p262_p1 }
   0xd   :  { %p265_p4 = pnand %p264_p3, %p258_p0 }
  0xc9   :  { %v90_v7 = vpop.f32.mrf.mxu0 }
  0xca   :  { %v91_v9 = vadd.f32 %v208_v6, %v90_v7 }
  0xcb   :  { %v229_v8 = vpop.f32.mrf.mxu0 }
  0xcc   :  { %v97_v13 = vmax.f32 %v91_v9, 0.0 }
  0xcd   :  { %v93_v10 = vpop.f32.mrf.mxu0 }
  0xce   :  { %v94_v11 = vadd.f32 %v208_v6, %v93_v10 }
  0xcf   :  { %v230_v12 = vpop.f32.mrf.mxu0 }
  0xd0   :  { %v98_v14 = vmax.f32 %v94_v11, 0.0 }
  0xd2   :  { %v99_v15 = vpack.c.bf16 %v98_v14, %v97_v13 }
  0xd4   :  { %236 = vmatmul.mubr.msk.bf16.vlgmr.msra.gmra.mxu1 %vm52_vm1, %v99_v15 }
 0x194   :  { %v160_v17 = vpop.f32.mrf.mxu1 }
 0x195   :  { %v161_v18 = vadd.f32 %v213_v16, %v160_v17 }
 0x196   :  { %v237_v19 = vpop.f32.mrf.mxu1 }
 0x197   :  { %v168_v20 = vsel %vm167_vm2, %v161_v18, -inf }
 0x198   :  { %169 = vmax.xlane.f32.xlu0 %v168_v20  ;;  %v163_v21 = vpop.f32.mrf.mxu1 }
 0x199   :  { %v164_v22 = vadd.f32 %v213_v16, %v163_v21 }
 0x19a   :  { %v238_v23 = vpop.f32.mrf.mxu1 }
 0x19b   :  { %v171_v24 = vsel %vm167_vm2, %v164_v22, -inf }
 0x19c   :  { %172 = vmax.xlane.f32.xlu0 %v171_v24 }
 0x221   :  { %v170_v25 = vpop.xlane.xlu0 %169 }
 0x222   :  { %v174_v26 = vsub.f32 %v161_v18, %v170_v25 }
 0x224   :  { %v176_v27 = vmul.f32 1.442695, %v174_v26 }
 0x225   :  { %v173_v28 = vpop.xlane.xlu0 %172 }
 0x226   :  { %249 = vpow2.f32 %v176_v27  ;;  %v175_v29 = vsub.f32 %v164_v22, %v173_v28 }
 0x228   :  { %v178_v30 = vmul.f32 1.442695, %v175_v29 }
 0x22a   :  { %251 = vpow2.f32 %v178_v30 }
 0x233   :  { %v250_v31 = vpop.eup %249 }
 0x234   :  { %v180_v32 = vsel %vm167_vm2, %v250_v31, 0.0 }
 0x235   :  { %181 = vadd.xlane.f32.xlu1 %v180_v32 }
 0x237   :  { %v252_v33 = vpop.eup %251 }
 0x238   :  { %v183_v34 = vsel %vm167_vm2, %v252_v33, 0.0 }
 0x239   :  { %184 = vadd.xlane.f32.xlu1 %v183_v34 }
 0x2be   :  { %v182_v35 = vpop.xlane.xlu1 %181 }
 0x2bf   :  { %253 = vrcp.f32 %v182_v35 }
 0x2c2   :  { %v185_v36 = vpop.xlane.xlu1 %184 }
 0x2c3   :  { %255 = vrcp.f32 %v185_v36 }
 0x2cc   :  { %v254_v37 = vpop.eup %253 }
 0x2cd   :  { %v187_v38 = vmul.f32 %v254_v37, %v250_v31 }
 0x2cf   :  { %190 = vst.msk [vmem:[#allocation2] sm:$0xff] %vm167_vm2, %v187_v38 }
 0x2d0   :  { %v256_v39 = vpop.eup %255 }
 0x2d1   :  { %v189_v40 = vmul.f32 %v256_v39, %v252_v33 }
 0x2d3   :  { %191 = vst.msk [vmem:[#allocation2 + $0x8] sm:$0xff] %vm167_vm2, %v189_v40 }
 0x2d4   :  { %268 = shalt.err (!%p265_p4)
}
 0x2d5   :  { %s282_s30 = smov 128   ;;  %s283_s6 = smov 8  }
 0x2d6   :  { %203 = dma.vmem_to_hbm [thread:$0]  %s198_s3, 256, %s351_s5, [#allocation3], %s282_s30, %s282_s30, %s283_s6  }
 0x2d7   :  { %277 = dma.done.wait [#allocation3], 256  }
 0x2d8   :  { %278 = vsyncadd [#allocation3], 4294967040 }
 0x2d9   :  { %207 = vsyncpa [#allocation3], 1 }

</bundles_post_ra>
